<compile_context>
chip_gen: v6e
topology: v6e:2x2x1
jax: 0.10.0
libtpu: 0.0.40
codegen_flags: <defaults>
</compile_context>

<pallas_src>
import functools

import jax
import jax.numpy as jnp
from jax import lax
from jax.experimental import pallas as pl
from jax.experimental.pallas import tpu as pltpu


def _round_up(x, m):
    return (x + m - 1) // m * m


def _cdiv(a, b):
    return -(-a // b)


def _hash_u32(x):
    # splitmix32-style finalizer: cheap VPU-only mixing, fine for dropout masks.
    x = x ^ (x >> jnp.uint32(16))
    x = x * jnp.uint32(0x7FEB352D)
    x = x ^ (x >> jnp.uint32(15))
    x = x * jnp.uint32(0x846CA68B)
    x = x ^ (x >> jnp.uint32(16))
    return x


def _mlp_kernel(seed_ref, x_ref, w_ref, b_ref, o_ref, *, dropout_p, training):
    w = w_ref[...]                                # (F_in, F_out_pad), compute dtype
    x = x_ref[...].astype(w.dtype)                # no-op when x already bf16/f32
    # Canonical MXU feed: (tm, K) @ (K, F_out_pad), f32 accumulation.
    y = jnp.dot(x, w, preferred_element_type=jnp.float32)
    y = y + b_ref[...]                            # bias kept in f32
    y = jnp.tanh(y)                               # EUP; epilogue stays f32

    if training and dropout_p > 0.0:
        if dropout_p >= 1.0:
            y = jnp.zeros_like(y)                 # drop everything; avoid inf scale
        else:
            tm, fo = y.shape
            # Global element id, computed fully in uint32 (wrap-safe for huge B*F).
            rows = lax.broadcasted_iota(jnp.int32, (tm, fo), 0).astype(jnp.uint32)
            cols = lax.broadcasted_iota(jnp.int32, (tm, fo), 1).astype(jnp.uint32)
            row0 = lax.convert_element_type(pl.program_id(0), jnp.uint32) * jnp.uint32(tm)
            ctr = (rows + row0) * jnp.uint32(fo) + cols
            seed = lax.convert_element_type(seed_ref[0], jnp.uint32) * jnp.uint32(0x9E3779B9)
            bits = _hash_u32(ctr + seed)
            thresh = jnp.uint32(min(int(dropout_p * 4294967296.0), 4294967295))
            scale = jnp.float32(1.0 / (1.0 - dropout_p))
            y = jnp.where(bits >= thresh, y * scale, 0.0)   # uint compare + select

    o_ref[...] = y.astype(o_ref.dtype)


def prepare_params(weight, bias, compute_dtype=jnp.float32):
    """One-time packing of nn.Linear params.

    weight (F_out, F_in) is transposed + lane-padded to (F_in, F_out_pad) so the
    kernel's RHS is the canonical lane-dense MXU feed; bias is padded to
    (1, F_out_pad) and kept in f32.  Per-call path then does no transpose/pad.
    """
    f_out, f_in = weight.shape
    f_out_pad = _round_up(f_out, 128)
    w = jnp.pad(weight.T, ((0, 0), (0, f_out_pad - f_out))).astype(compute_dtype)
    b = jnp.pad(bias, (0, f_out_pad - f_out)).astype(jnp.float32).reshape(1, f_out_pad)
    return w, b, f_out


def mlp_forward(x, w_pad, b_pad, f_out, *, dropout_p=0.05, training=False, seed=0,
                out_dtype=None, max_tile_rows=4096, vmem_tile_budget=16 << 20,
                block_rows=None, return_padded=False):
    """x: (B, F_in). w_pad/b_pad/f_out from prepare_params. Returns (B, F_out)
    (or the padded (b_rows, F_out_pad) buffer when return_padded=True)."""
    B, f_in = x.shape
    f_in_w, f_out_pad = w_pad.shape
    assert f_in == f_in_w, "feature mismatch between x and weight"
    out_dtype = x.dtype if out_dtype is None else out_dtype

    bx = jnp.dtype(x.dtype).itemsize
    bo = jnp.dtype(out_dtype).itemsize
    bw = jnp.dtype(w_pad.dtype).itemsize
    # 16-row alignment matches bf16 sublane packing; 8 for f32.
    align = 16 if jnp.dtype(w_pad.dtype) == jnp.dtype(jnp.bfloat16) else 8

    if block_rows is not None:
        tm = _round_up(block_rows, align)
    else:
        # Batch tile from a VMEM budget: double-buffered x/out tiles + f32 epilogue.
        per_row = 2 * f_in * bx + 2 * f_out_pad * bo + f_out_pad * 4
        tm = max(align, (min(max_tile_rows, vmem_tile_budget // per_row) // align) * align)
        if B <= tm:
            if B >= 2048:
                # Keep >= 2 grid steps so both v7x TensorCores take half the batch.
                tm = _round_up(_cdiv(B, 2), align)
            else:
                tm = _round_up(B, align)

    grid_n = _cdiv(B, tm)
    b_rows = grid_n * tm
    if b_rows != B:
        # Only pad when B is not a tile multiple (extra HBM pass otherwise avoided).
        x = jnp.pad(x, ((0, b_rows - B), (0, 0)))

    # Explicit VMEM limit sized from the actual tile footprint (v7x: 64 MiB phys).
    vmem_est = (2 * tm * f_in * bx + 2 * tm * f_out_pad * bo
                + 2 * f_in * f_out_pad * bw + 2 * f_out_pad * 4
                + tm * f_out_pad * 4)
    vmem_limit = int(min(100 << 20, max(32 << 20, vmem_est * 3 // 2)))

    seed_arr = jnp.asarray([seed], dtype=jnp.int32)
    kernel = functools.partial(_mlp_kernel, dropout_p=float(dropout_p),
                               training=bool(training))

    out = pl.pallas_call(
        kernel,
        out_shape=jax.ShapeDtypeStruct((b_rows, f_out_pad), out_dtype),
        grid_spec=pltpu.PrefetchScalarGridSpec(
            num_scalar_prefetch=1,               # dropout seed lands in SMEM
            grid=(grid_n,),
            in_specs=[
                pl.BlockSpec((tm, f_in), lambda i, seed: (i, 0)),
                pl.BlockSpec((f_in, f_out_pad), lambda i, seed: (0, 0)),
                pl.BlockSpec((1, f_out_pad), lambda i, seed: (0, 0)),
            ],
            out_specs=pl.BlockSpec((tm, f_out_pad), lambda i, seed: (i, 0)),
        ),
        compiler_params=pltpu.CompilerParams(
            dimension_semantics=("parallel",),   # megacore-shardable over batch
            vmem_limit_bytes=vmem_limit),
    )(seed_arr, x, w_pad, b_pad)

    if return_padded:
        return out
    return out[:B, :f_out]


if __name__ == "__main__":
    # Small shapes consistent with the module: batch=8, in_channels=16, channels=32
    B, F_IN, F_OUT = 8, 16, 32
    key = jax.random.PRNGKey(0)
    kx, kw, kb = jax.random.split(key, 3)

    x = jax.random.normal(kx, (B, F_IN), dtype=jnp.float32)
    # Deterministic init mimicking nn.Linear's uniform(-1/sqrt(fan_in), 1/sqrt(fan_in))
    bound = 1.0 / jnp.sqrt(jnp.float32(F_IN))
    weight = jax.random.uniform(kw, (F_OUT, F_IN), jnp.float32, -bound, bound)
    bias = jax.random.uniform(kb, (F_OUT,), jnp.float32, -bound, bound)

    ref = jnp.tanh(jnp.dot(x, weight.T, precision=lax.Precision.HIGHEST) + bias)

    # f32 compute path, eval mode (dropout is identity, matching nn.Dropout.eval()).
    w32, b32, f_out = prepare_params(weight, bias, compute_dtype=jnp.float32)
    out_eval = jax.block_until_ready(mlp_forward(x, w32, b32, f_out, training=False))
    assert out_eval.shape == (B, F_OUT)
    assert jnp.allclose(out_eval, ref, atol=1e-2, rtol=1e-2), "eval mismatch vs reference"

    # f32 training path: every element is either dropped (0) or scaled by 1/(1-p).
    p = 0.05
    out_train = jax.block_until_ready(
        mlp_forward(x, w32, b32, f_out, dropout_p=p, training=True, seed=123))
    kept = out_train != 0.0
    expect = jnp.where(kept, out_eval / (1.0 - p), 0.0)
    assert jnp.allclose(out_train, expect, atol=1e-5, rtol=1e-5), "dropout structure mismatch"
    assert float(1.0 - jnp.mean(kept.astype(jnp.float32))) < 0.25, "dropout rate far off"

    # bf16 MXU-input path (v6e/v7x recommendation): f32 accumulate, bf16 output I/O.
    wb16, bb16, _ = prepare_params(weight, bias, compute_dtype=jnp.bfloat16)
    out_bf16 = jax.block_until_ready(
        mlp_forward(x.astype(jnp.bfloat16), wb16, bb16, f_out,
                    training=False, out_dtype=jnp.bfloat16))
    assert out_bf16.dtype == jnp.bfloat16
    assert jnp.allclose(out_bf16.astype(jnp.float32), ref, atol=5e-2, rtol=5e-2), \
        "bf16 path mismatch"

    # Multi-tile + ragged-batch path (grid > 1, last tile padded in the wrapper).
    B2 = 40
    x2 = jax.random.normal(jax.random.PRNGKey(7), (B2, F_IN), dtype=jnp.float32)
    ref2 = jnp.tanh(jnp.dot(x2, weight.T, precision=lax.Precision.HIGHEST) + bias)
    out2 = jax.block_until_ready(
        mlp_forward(x2, w32, b32, f_out, training=False, block_rows=16))
    assert out2.shape == (B2, F_OUT)
    assert jnp.allclose(out2, ref2, atol=1e-2, rtol=1e-2), "multi-tile mismatch"

    print("KERNEL_OK")
</pallas_src>

<mosaic_0001>
module attributes {stable_mosaic.version = 11 : i64} {
  func.func @_mlp_kernel(%arg0: i32, %arg1: memref<1xi32, #tpu.memory_space<smem>>, %arg2: memref<8x16xf32, #tpu.memory_space<vmem>>, %arg3: memref<16x128xf32, #tpu.memory_space<vmem>>, %arg4: memref<1x128xf32, #tpu.memory_space<vmem>>, %arg5: memref<8x128xf32, #tpu.memory_space<vmem>>) attributes {dimension_semantics = [#tpu.dimension_semantics<parallel>], iteration_bounds = array<i64: 1>, scalar_prefetch = 1 : i64, scratch_operands = 0 : i64, tpu.core_type = #tpu.core_type<tc>, window_params = [{transform_indices = @transform_0, window_bounds = array<i64: 8, 16>}, {pipeline_mode = #tpu.pipeline_mode<synchronous>, transform_indices = @transform_1, window_bounds = array<i64: 16, 128>}, {pipeline_mode = #tpu.pipeline_mode<synchronous>, transform_indices = @transform_2, window_bounds = array<i64: 1, 128>}, {transform_indices = @transform_3, window_bounds = array<i64: 8, 128>}]} {
    %c0 = arith.constant 0 : index
    %c0_0 = arith.constant 0 : index
    %0 = vector.load %arg3[%c0, %c0_0] : memref<16x128xf32, #tpu.memory_space<vmem>>, vector<16x128xf32>
    %c0_1 = arith.constant 0 : index
    %c0_2 = arith.constant 0 : index
    %1 = vector.load %arg2[%c0_1, %c0_2] : memref<8x16xf32, #tpu.memory_space<vmem>>, vector<8x16xf32>
    %cst = arith.constant dense<0.000000e+00> : vector<8x128xf32>
    %2 = tpu.matmul %1, %0, %cst {dimension_numbers = #tpu.dot_dimension_numbers<[1], [0], [0], [1], [0, 0, 1, 1], [], []>} : vector<8x16xf32>, vector<16x128xf32>, vector<8x128xf32> -> vector<8x128xf32>
    %c0_3 = arith.constant 0 : index
    %c0_4 = arith.constant 0 : index
    %3 = vector.load %arg4[%c0_3, %c0_4] : memref<1x128xf32, #tpu.memory_space<vmem>>, vector<1x128xf32>
    %4 = vector.broadcast %3 : vector<1x128xf32> to vector<8x128xf32>
    %5 = arith.addf %2, %4 : vector<8x128xf32>
    %6 = math.tanh %5 : vector<8x128xf32>
    %c0_5 = arith.constant 0 : index
    %c0_6 = arith.constant 0 : index
    %7 = vector.load %arg5[%c0_5, %c0_6] : memref<8x128xf32, #tpu.memory_space<vmem>>, vector<8x128xf32>
    tpu.vector_store %arg5[%c0_5, %c0_6], %6 {strides = array<i32>} : memref<8x128xf32, #tpu.memory_space<vmem>>, vector<8x128xf32>,
    return
  }
  func.func @transform_0(%arg0: i32, %arg1: memref<1xi32, #tpu.memory_space<smem>>) -> (i32, i32) {
    %c0_i32 = arith.constant 0 : i32
    %c0_i32_0 = arith.constant 0 : i32
    return %arg0, %c0_i32 : i32, i32
  }
  func.func @transform_1(%arg0: i32, %arg1: memref<1xi32, #tpu.memory_space<smem>>) -> (i32, i32) {
    %c0_i32 = arith.constant 0 : i32
    %c0_i32_0 = arith.constant 0 : i32
    %c0_i32_1 = arith.constant 0 : i32
    return %c0_i32, %c0_i32_0 : i32, i32
  }
  func.func @transform_2(%arg0: i32, %arg1: memref<1xi32, #tpu.memory_space<smem>>) -> (i32, i32) {
    %c0_i32 = arith.constant 0 : i32
    %c0_i32_0 = arith.constant 0 : i32
    %c0_i32_1 = arith.constant 0 : i32
    return %c0_i32, %c0_i32_0 : i32, i32
  }
  func.func @transform_3(%arg0: i32, %arg1: memref<1xi32, #tpu.memory_space<smem>>) -> (i32, i32) {
    %c0_i32 = arith.constant 0 : i32
    %c0_i32_0 = arith.constant 0 : i32
    return %arg0, %c0_i32 : i32, i32
  }
}

</mosaic_0001>

<bundles_post_ra>
// kernel: tpu_custom_call.1
= control target key start
LH: loop header
LB: loop body
LE: loop exit
PB: predicated region body
PF: predicated region fallthrough
CT: control target
= control target key end

     0   :  { %10 = vsyncpa [#allocation5], 0  ;;  %s276_s0 = inlined_call_operand.<no memory space> [shape: s32[1], index: 0, kind: input, shape index: {}]   ;;  %s277_s1 = inlined_call_operand.hbm [shape: f32[8,16], index: 1, kind: input, shape index: {}]   ;;  %s278_s2 = inlined_call_operand.hbm [shape: f32[16,128], index: 2, kind: input, shape index: {}]   ;;  %s279_s3 = inlined_call_operand.vmem [shape: f32[1,128], index: 3, kind: input, shape index: {}]   ;;  %s280_s4 = inlined_call_operand.hbm [shape: f32[8,128], index: 4, kind: output, shape index: {}]  }
   0x1   :  { %11 = vsyncpa [#allocation8], 0 }
   0x2   :  { %12 = vsyncpa [#allocation6], 0  ;;  %s232_s15 = smov [#allocation4]   ;;  %s233_s17 = smov [#allocation7]  }
   0x3   :  { %s19_s16 = sshll.u32 %s232_s15, 4  ;;  %s28_s18 = sshll.u32 %s233_s17, 4  ;;  %s20_s16 = int_to_ptr.vmem [resolvable:$true] %s19_s16  ;;  %s29_s18 = int_to_ptr.vmem [resolvable:$true] %s28_s18 }
   0x4   :  { %s174_s0 = scalar_lea.vmem %s20_s16, 128  ;;  %p179_p1 = scmp.lt.s32.totalorder %s20_s16, %s20_s16 }
   0x5   :  { %p175_p0 = scmp.ne.s32.totalorder %s20_s16, %s174_s0  ;;  %p180_p2 = scmp.lt.s32.totalorder %s174_s0, %s174_s0 }
   0x7   :  { %p181_p3 = por %p180_p2, %p179_p1 }
   0x9   :  { %p182_p4 = pnand %p181_p3, %p175_p0 }
   0xb   :  { %185 = shalt.err (!%p182_p4)
}
   0xc   :  { %22 = dma.hbm_to_vmem [thread:$0]  %s277_s1, 128, %s20_s16, [#allocation5]  }
   0xd   :  { %s194_s21 = scalar_lea.vmem %s29_s18, 256  ;;  %p199_p6 = scmp.lt.s32.totalorder %s29_s18, %s29_s18 }
   0xe   :  { %p195_p5 = scmp.ne.s32.totalorder %s29_s18, %s194_s21  ;;  %p200_p7 = scmp.lt.s32.totalorder %s194_s21, %s194_s21 }
  0x10   :  { %p201_p8 = por %p200_p7, %p199_p6 }
  0x12   :  { %p202_p9 = pnand %p201_p8, %p195_p5 }
  0x14   :  { %205 = shalt.err (!%p202_p9)
}
  0x15   :  { %s234_s22 = smov 128   ;;  %s235_s23 = smov 8  }
  0x16   :  { %34 = dma.hbm_to_vmem [thread:$0]  %s278_s2, 256, %s29_s18, [#allocation8], %s234_s22, %s234_s22, %s235_s23  }
  0x17   :  { %226 = dma.done.wait [#allocation5], 128  }
  0x18   :  { %227 = vsyncadd [#allocation5], 4294967168 }
  0x19   :  { %228 = dma.done.wait [#allocation8], 256  }
  0x1a   :  { %229 = vsyncadd [#allocation8], 4294967040  ;;  %v236_v0 = vmov 0.0   ;;  %vm237_vm0 = vmmov 0   ;;  %v44_v1 = vld [vmem:[#allocation7 + $0x8] sm:$0xff]  ;;  %v43_v2 = vld [vmem:[#allocation7] sm:$0xff] }
  0x1b   :  { %150 = vmatprep.subr.mxu0 %v236_v0  ;;  %154 = vmatprep.mubr.msk.f32.mxu0 %vm237_vm0, %v236_v0  ;;  %v45_v3 = vld [vmem:[#allocation4] sm:$0xff]  ;;  %vm53_vm1 = vcmask 130048   ;;  %s238_s2 = smov [#allocation9]  }
  0x1c   :  { %151 = vmatpush3.msra.mxu0 %v44_v1  ;;  %v145_v4 = vld [vmem:[%s279_s3] ss:$0 sm:$0xff]  ;;  %s135_s27 = sshll.u32 %s238_s2, 4  ;;  %s136_s27 = int_to_ptr.vmem [resolvable:$true] %s135_s27 }
  0x1d   :  { %152 = vmatprep.subr.mxu0 %v236_v0  ;;  %s206_s28 = scalar_lea.vmem %s136_s27, 128  ;;  %p211_p11 = scmp.lt.s32.totalorder %s136_s27, %s136_s27 }
  0x1e   :  { %153 = vmatpush3.msra.mxu0 %v43_v2  ;;  %p207_p10 = scmp.ne.s32.totalorder %s136_s27, %s206_s28  ;;  %p212_p12 = scmp.lt.s32.totalorder %s206_s28, %s206_s28 }
  0x1f   :  { %155 = vmatmul.mubr.msk.f32.vlgmr.msra.gmra.mxu0 %vm53_vm1, %v45_v3 }
  0x20   :  { %p213_p13 = por %p212_p12, %p211_p11 }
  0x22   :  { %p214_p0 = pnand %p213_p13, %p207_p10 }
  0xdf   :  { %v123_v5 = vpop.f32.mrf.mxu0 }
  0xe0   :  { %v124_v6 = vadd.f32 %v145_v4, %v123_v5 }
  0xe1   :  { %v156_v7 = vpop.f32.mrf.mxu0 }
  0xe2   :  { %164 = vtanh.f32 %v124_v6 }
  0xef   :  { %v165_v8 = vpop.eup %164 }
  0xf0   :  { %128 = vst [vmem:[#allocation9] sm:$0xff] %v165_v8 }
  0xf1   :  { %217 = shalt.err (!%p214_p0)
}
  0xf2   :  { %138 = dma.vmem_to_hbm [thread:$0]  %s136_s27, 128, %s280_s4, [#allocation6]  }
  0xf3   :  { %230 = dma.done.wait [#allocation6], 128  }
  0xf4   :  { %231 = vsyncadd [#allocation6], 4294967168 }
  0xf5   :  { %142 = vsyncpa [#allocation5], 1 }
  0xf6   :  { %143 = vsyncpa [#allocation8], 1 }
  0xf7   :  { %144 = vsyncpa [#allocation6], 1 }

</bundles_post_ra>
